<compile_context>
chip_gen: v5e
topology: v5e:2x2
jax: 0.10.0
libtpu: 0.0.40
codegen_flags: <defaults>
</compile_context>

<pallas_src>
import functools

import jax
import jax.numpy as jnp
from jax.experimental import pallas as pl
from jax.experimental.pallas import tpu as pltpu

MARGIN = 2.0
_PAIRWISE_EPS = 1e-6  # torch.nn.functional.pairwise_distance default eps


def _vmem_capacity_bytes():
    # 64 MiB on v7x, 128 MiB on v5e/v6e; fall back conservatively.
    try:
        return int(pltpu.get_tpu_info().vmem_capacity_bytes)
    except Exception:
        return 64 * 1024 * 1024


def _feature_spec(block_shape, index_map, deep):
    """Feature-input BlockSpec; request 3-deep buffering when available."""
    if deep and hasattr(pl, "Buffered"):
        try:
            return pl.BlockSpec(block_shape, index_map,
                                pipeline_mode=pl.Buffered(3))
        except TypeError:
            pass
    return pl.BlockSpec(block_shape, index_map)


def _contrastive_loss_kernel(o1_ref, o2_ref, label_ref, out_ref, *,
                             b_total, tile_rows, tiles_per_part,
                             num_real_tiles, margin, label_is_full,
                             needs_mask):
    p = pl.program_id(0)          # parallel partition
    i = pl.program_id(1)          # arbitrary (reduction) axis
    step = p * tiles_per_part + i  # global tile index

    # Zero this partition's resident accumulator on its first inner step.
    @pl.when(i == 0)
    def _():
        out_ref[...] = jnp.zeros_like(out_ref)

    # Stream features in their native dtype; do the math in f32.
    o1 = o1_ref[...].astype(jnp.float32)
    o2 = o2_ref[...].astype(jnp.float32)
    diff = o1 - o2 + _PAIRWISE_EPS                     # (TB, D) f32
    d2 = jnp.sum(diff * diff, axis=-1, keepdims=True)  # (TB, 1)
    d = jnp.sqrt(d2)                                   # only for the margin term

    if label_is_full:
        start = pl.multiple_of(step * tile_rows, 8)
        lbl = label_ref[pl.ds(start, tile_rows), :]    # (TB, 1) slice of resident label
    else:
        lbl = label_ref[...]                           # (TB, 1) per-tile block
    lbl = lbl.astype(jnp.float32)

    per_row = (1.0 - lbl) * d2 + lbl * jnp.square(jnp.maximum(margin - d, 0.0))

    def _accum(rows):
        out_ref[...] += jnp.sum(rows, axis=0, keepdims=True).reshape(1, 1, 1)

    if needs_mask:
        last_real = num_real_tiles - 1

        # Fully-valid tiles: no mask work at all.
        @pl.when(step < last_real)
        def _():
            _accum(per_row)

        # Last real (possibly ragged) tile and any phantom steps from the
        # parallel split: keep the SELECT form so garbage rows cannot leak.
        @pl.when(step >= last_real)
        def _():
            row = step * tile_rows + jax.lax.broadcasted_iota(
                jnp.int32, (tile_rows, 1), 0)
            _accum(jnp.where(row < b_total, per_row, 0.0))
    else:
        _accum(per_row)


def contrastive_loss(output1, output2, label, *, margin=MARGIN, tile_rows=None):
    """output1, output2: (B, D) float32/bfloat16; label: (B,) or (B, 1).

    Returns the scalar mean contrastive loss (float32).
    """
    output1 = jnp.asarray(output1)
    output2 = jnp.asarray(output2)
    if output2.dtype != output1.dtype:
        output2 = output2.astype(output1.dtype)
    B, D = output1.shape
    itemsize = jnp.dtype(output1.dtype).itemsize
    row_align = 8 if itemsize >= 4 else 16     # sublane tiling (f32 vs bf16)

    vmem_cap = _vmem_capacity_bytes()
    # Per-step DMA target (both feature arrays combined): ~3 MiB on v7x
    # (64 MiB VMEM), ~6 MiB on v5e/v6e. HBM roofline saturates well below this.
    step_target = 3 * 2**20 if vmem_cap <= 64 * 2**20 else 6 * 2**20

    if tile_rows is None:
        tb = step_target // max(1, 2 * D * itemsize)
        tb = max(row_align, (tb // row_align) * row_align)
    else:
        tb = max(1, int(tile_rows))
    if tb >= B:
        tb = B                                  # single tile == full dim (legal)
    elif tb % row_align:
        tb = min(B, ((tb + row_align - 1) // row_align) * row_align)

    num_real_tiles = -(-B // tb)
    num_parts = 2 if num_real_tiles >= 2 else 1          # v7x: one per TensorCore
    tiles_per_part = -(-num_real_tiles // num_parts)
    grid_steps = num_parts * tiles_per_part
    padded_rows = grid_steps * tb
    needs_mask = padded_rows != B
    clamp = grid_steps != num_real_tiles                   # phantom steps exist

    # Label: tiny wrapper-side pad/reshape (B*4 bytes) so every block index /
    # in-kernel slice stays in bounds; padded rows are zeros (and masked).
    lbl_flat = jnp.asarray(label).reshape(B).astype(jnp.float32)
    if padded_rows != B:
        lbl_flat = jnp.pad(lbl_flat, (0, padded_rows - B))
    label2d = lbl_flat.reshape(padded_rows, 1)

    # Small/medium batch: keep the whole label resident in VMEM (one block,
    # constant index -> fetched once), slice per tile in-kernel.
    label_is_full = grid_steps > 1 and padded_rows * 512 * 2 <= 8 * 2**20

    def feat_index(p, i):
        step = p * tiles_per_part + i
        if clamp:
            step = jnp.minimum(step, num_real_tiles - 1)
        return (step, 0)

    deep = grid_steps >= 3
    feat_specs = [_feature_spec((tb, D), feat_index, deep),
                  _feature_spec((tb, D), feat_index, deep)]

    if label_is_full:
        label_spec = pl.BlockSpec((padded_rows, 1), lambda p, i: (0, 0))
    else:
        label_spec = pl.BlockSpec((tb, 1),
                                  lambda p, i: (p * tiles_per_part + i, 0))

    kernel = functools.partial(
        _contrastive_loss_kernel,
        b_total=B, tile_rows=tb, tiles_per_part=tiles_per_part,
        num_real_tiles=num_real_tiles, margin=float(margin),
        label_is_full=label_is_full, needs_mask=needs_mask)

    cost = pl.CostEstimate(
        flops=4 * B * D + 8 * B,
        transcendentals=B,                                   # one sqrt per row
        bytes_accessed=2 * B * D * itemsize + padded_rows * 4 + num_parts * 4,
    )

    partials = pl.pallas_call(
        kernel,
        out_shape=jax.ShapeDtypeStruct((num_parts, 1, 1), jnp.float32),
        grid_spec=pltpu.PrefetchScalarGridSpec(
            num_scalar_prefetch=0,
            grid=(num_parts, tiles_per_part),
            in_specs=feat_specs + [label_spec],
            # One resident accumulator block per parallel partition.
            out_specs=pl.BlockSpec((1, 1, 1), lambda p, i: (p, 0, 0)),
        ),
        compiler_params=pltpu.CompilerParams(
            dimension_semantics=("parallel", "arbitrary"),
            vmem_limit_bytes=min(64 * 2**20, (5 * vmem_cap) // 8),
        ),
        cost_estimate=cost,
    )(output1, output2, label2d)

    return jnp.sum(partials) * (1.0 / B)


def _reference_loss(output1, output2, label, margin=MARGIN):
    # Pure-JAX reference mirroring the PyTorch forward (f32 math).
    o1 = jnp.asarray(output1).astype(jnp.float32)
    o2 = jnp.asarray(output2).astype(jnp.float32)
    lbl = jnp.asarray(label).reshape(o1.shape[0], 1).astype(jnp.float32)
    diff = o1 - o2 + _PAIRWISE_EPS
    d = jnp.sqrt(jnp.sum(diff * diff, axis=-1, keepdims=True))
    loss = (1.0 - lbl) * d**2 + lbl * jnp.clip(margin - d, 0.0, None) ** 2
    return jnp.mean(loss)


if __name__ == "__main__":
    key = jax.random.PRNGKey(0)
    ks = jax.random.split(key, 9)

    # Case 1: small single-tile f32 path (B=8, D=32); P=1.
    B, D = 8, 32
    o1 = jax.random.normal(ks[0], (B, D), dtype=jnp.float32)
    o2 = jax.random.normal(ks[1], (B, D), dtype=jnp.float32)
    lbl = jax.random.bernoulli(ks[2], p=0.5, shape=(B, 1)).astype(jnp.float32)
    loss = jax.block_until_ready(contrastive_loss(o1, o2, lbl))
    ref = jax.block_until_ready(_reference_loss(o1, o2, lbl))
    assert jnp.allclose(loss, ref, rtol=1e-4, atol=1e-4), (loss, ref)

    # Case 2: ragged multi-tile f32 (B=20, forced 8-row tiles): 3 real tiles,
    # P=2 split -> clamped phantom step, masked last tile, resident-label slice.
    B2, D2 = 20, 32
    o1b = jax.random.normal(ks[3], (B2, D2), dtype=jnp.float32)
    o2b = jax.random.normal(ks[4], (B2, D2), dtype=jnp.float32)
    lblb = jax.random.bernoulli(ks[5], p=0.5, shape=(B2, 1)).astype(jnp.float32)
    loss2 = jax.block_until_ready(contrastive_loss(o1b, o2b, lblb, tile_rows=8))
    ref2 = jax.block_until_ready(_reference_loss(o1b, o2b, lblb))
    assert jnp.allclose(loss2, ref2, rtol=1e-4, atol=1e-4), (loss2, ref2)

    # Case 3: native bf16 features (no wrapper upcast), exact tiling (no mask):
    # B=64, D=128, 16-row tiles -> 4 tiles split across P=2.
    B3, D3 = 64, 128
    o1c = jax.random.normal(ks[6], (B3, D3), dtype=jnp.bfloat16)
    o2c = jax.random.normal(ks[7], (B3, D3), dtype=jnp.bfloat16)
    lblc = jax.random.bernoulli(ks[8], p=0.5, shape=(B3, 1)).astype(jnp.float32)
    loss3 = jax.block_until_ready(contrastive_loss(o1c, o2c, lblc, tile_rows=16))
    ref3 = jax.block_until_ready(_reference_loss(o1c, o2c, lblc))
    assert jnp.allclose(loss3, ref3, rtol=1e-4, atol=1e-4), (loss3, ref3)

    print("KERNEL_OK")
</pallas_src>

<mosaic_0001>
module attributes {stable_mosaic.version = 11 : i64} {
  func.func @_contrastive_loss_kernel(%arg0: i32, %arg1: i32, %arg2: memref<8x32xf32, #tpu.memory_space<vmem>>, %arg3: memref<8x32xf32, #tpu.memory_space<vmem>>, %arg4: memref<8x1xf32, #tpu.memory_space<vmem>>, %arg5: memref<1x1x1xf32, #tpu.memory_space<vmem>>) attributes {dimension_semantics = [#tpu.dimension_semantics<parallel>, #tpu.dimension_semantics<arbitrary>], iteration_bounds = array<i64: 1, 1>, scalar_prefetch = 0 : i64, scratch_operands = 0 : i64, tpu.core_type = #tpu.core_type<tc>, window_params = [{transform_indices = @transform_0, window_bounds = array<i64: 8, 32>}, {transform_indices = @transform_1, window_bounds = array<i64: 8, 32>}, {transform_indices = @transform_2, window_bounds = array<i64: 8, 1>}, {transform_indices = @transform_3, window_bounds = array<i64: 1, 1, 1>}]} {
    %c0_i32 = arith.constant 0 : i32
    %0 = arith.cmpi eq, %arg1, %c0_i32 : i32
    %1 = arith.extui %0 : i1 to i32
    %c0_i32_0 = arith.constant 0 : i32
    %2 = arith.cmpi ne, %1, %c0_i32_0 : i32
    scf.if %2 {
      %cst_17 = arith.constant 0.000000e+00 : f32
      %29 = vector.broadcast %cst_17 : f32 to vector<1x1x1xf32>
      %c0_18 = arith.constant 0 : index
      %c0_19 = arith.constant 0 : index
      %c0_20 = arith.constant 0 : index
      %30 = vector.load %arg5[%c0_18, %c0_19, %c0_20] : memref<1x1x1xf32, #tpu.memory_space<vmem>>, vector<1x1x1xf32>
      tpu.vector_store %arg5[%c0_18, %c0_19, %c0_20], %29 {strides = array<i32>} : memref<1x1x1xf32, #tpu.memory_space<vmem>>, vector<1x1x1xf32>,
    } else {
    }
    %c0 = arith.constant 0 : index
    %c0_1 = arith.constant 0 : index
    %3 = vector.load %arg2[%c0, %c0_1] : memref<8x32xf32, #tpu.memory_space<vmem>>, vector<8x32xf32>
    %c0_2 = arith.constant 0 : index
    %c0_3 = arith.constant 0 : index
    %4 = vector.load %arg3[%c0_2, %c0_3] : memref<8x32xf32, #tpu.memory_space<vmem>>, vector<8x32xf32>
    %5 = arith.subf %3, %4 : vector<8x32xf32>
    %cst = arith.constant 9.99999997E-7 : f32
    %6 = vector.broadcast %cst : f32 to vector<8x32xf32>
    %7 = arith.addf %5, %6 : vector<8x32xf32>
    %8 = arith.mulf %7, %7 : vector<8x32xf32>
    %cst_4 = arith.constant dense<0.000000e+00> : vector<8xf32>
    %9 = vector.multi_reduction <add>, %8, %cst_4 [1] : vector<8x32xf32> to vector<8xf32>
    %10 = vector.shape_cast %9 : vector<8xf32> to vector<8x1xf32>
    %11 = math.sqrt %10 : vector<8x1xf32>
    %c0_5 = arith.constant 0 : index
    %c0_6 = arith.constant 0 : index
    %12 = vector.load %arg4[%c0_5, %c0_6] : memref<8x1xf32, #tpu.memory_space<vmem>>, vector<8x1xf32>
    %cst_7 = arith.constant 1.000000e+00 : f32
    %13 = vector.broadcast %cst_7 : f32 to vector<8x1xf32>
    %14 = arith.subf %13, %12 : vector<8x1xf32>
    %15 = arith.mulf %14, %10 : vector<8x1xf32>
    %cst_8 = arith.constant 2.000000e+00 : f32
    %16 = vector.broadcast %cst_8 : f32 to vector<8x1xf32>
    %17 = arith.subf %16, %11 : vector<8x1xf32>
    %cst_9 = arith.constant 0.000000e+00 : f32
    %18 = vector.broadcast %cst_9 : f32 to vector<8x1xf32>
    %19 = arith.maximumf %17, %18 : vector<8x1xf32>
    %20 = arith.mulf %19, %19 : vector<8x1xf32>
    %21 = arith.mulf %12, %20 : vector<8x1xf32>
    %22 = arith.addf %15, %21 : vector<8x1xf32>
    %c0_10 = arith.constant 0 : index
    %c0_11 = arith.constant 0 : index
    %c0_12 = arith.constant 0 : index
    %23 = vector.load %arg5[%c0_10, %c0_11, %c0_12] : memref<1x1x1xf32, #tpu.memory_space<vmem>>, vector<1x1x1xf32>
    %cst_13 = arith.constant dense<0.000000e+00> : vector<1xf32>
    %24 = vector.multi_reduction <add>, %22, %cst_13 [0] : vector<8x1xf32> to vector<1xf32>
    %25 = vector.shape_cast %24 : vector<1xf32> to vector<1x1xf32>
    %26 = vector.shape_cast %25 : vector<1x1xf32> to vector<1x1x1xf32>
    %27 = arith.addf %23, %26 : vector<1x1x1xf32>
    %c0_14 = arith.constant 0 : index
    %c0_15 = arith.constant 0 : index
    %c0_16 = arith.constant 0 : index
    %28 = vector.load %arg5[%c0_14, %c0_15, %c0_16] : memref<1x1x1xf32, #tpu.memory_space<vmem>>, vector<1x1x1xf32>
    tpu.vector_store %arg5[%c0_14, %c0_15, %c0_16], %27 {strides = array<i32>} : memref<1x1x1xf32, #tpu.memory_space<vmem>>, vector<1x1x1xf32>,
    return
  }
  func.func @transform_0(%arg0: i32, %arg1: i32) -> (i32, i32) {
    %c1_i32 = arith.constant 1 : i32
    %0 = arith.muli %arg0, %c1_i32 : i32
    %1 = arith.addi %0, %arg1 : i32
    %c0_i32 = arith.constant 0 : i32
    %c0_i32_0 = arith.constant 0 : i32
    return %1, %c0_i32 : i32, i32
  }
  func.func @transform_1(%arg0: i32, %arg1: i32) -> (i32, i32) {
    %c1_i32 = arith.constant 1 : i32
    %0 = arith.muli %arg0, %c1_i32 : i32
    %1 = arith.addi %0, %arg1 : i32
    %c0_i32 = arith.constant 0 : i32
    %c0_i32_0 = arith.constant 0 : i32
    return %1, %c0_i32 : i32, i32
  }
  func.func @transform_2(%arg0: i32, %arg1: i32) -> (i32, i32) {
    %c1_i32 = arith.constant 1 : i32
    %0 = arith.muli %arg0, %c1_i32 : i32
    %1 = arith.addi %0, %arg1 : i32
    %c0_i32 = arith.constant 0 : i32
    %c0_i32_0 = arith.constant 0 : i32
    return %1, %c0_i32 : i32, i32
  }
  func.func @transform_3(%arg0: i32, %arg1: i32) -> (i32, i32, i32) {
    %c0_i32 = arith.constant 0 : i32
    %c0_i32_0 = arith.constant 0 : i32
    %c0_i32_1 = arith.constant 0 : i32
    return %arg0, %c0_i32, %c0_i32_0 : i32, i32, i32
  }
}

</mosaic_0001>

<bundles_post_ra>
// kernel: tpu_custom_call.1
= control target key start
LH: loop header
LB: loop body
LE: loop exit
PB: predicated region body
PF: predicated region fallthrough
CT: control target
= control target key end

     0   :  { %8 = vsyncpa [#allocation3], 0  ;;  %s237_s0 = inlined_call_operand.vmem [shape: f32[8,32], index: 0, kind: input, shape index: {}]   ;;  %s238_s1 = inlined_call_operand.hbm [shape: f32[8,32], index: 1, kind: input, shape index: {}]   ;;  %s239_s2 = inlined_call_operand.vmem [shape: f32[8,1], index: 2, kind: input, shape index: {}]   ;;  %s240_s3 = inlined_call_operand.hbm [shape: f32[1,1,1], index: 3, kind: output, shape index: {}]  }
   0x1   :  { %9 = vsyncpa [#allocation4], 0  ;;  %s26_s14 = sshll.u32 %s238_s1, 4  ;;  %s200_s15 = smov [#allocation2]   ;;  %s27_s14 = int_to_ptr.hbm [resolvable:$true] %s26_s14 }
   0x2   :  { %s28_s16 = sshll.u32 %s200_s15, 4  ;;  %s29_s16 = int_to_ptr.vmem [resolvable:$true] %s28_s16 }
   0x3   :  { %31 = dma.hbm_to_vmem [thread:$0]  %s27_s14, 128, %s29_s16, [#allocation3]  }
   0x4   :  { %196 = dma.done.wait [#allocation3], 128  }
   0x5   :  { %197 = vsyncadd [#allocation3], 4294967168  ;;  %v73_v0 = vld [vmem:[%s237_s0] sm:$0xff]  ;;  %vm78_vm0 = vcmask 261120   ;;  %vm71_vm1 = vcmask 0   ;;  %v201_v6 = vmov 0.0  }
   0x6   :  { %v74_v1 = vld [vmem:[#allocation2] sm:$0xff]  ;;  %72 = vst.msk [vmem:[#allocation5] sm:$0x1] %vm71_vm1, %v201_v6  ;;  %vm103_vm4 = vcmask 7168   ;;  %s202_s19 = smov [#allocation5]  }
   0x7   :  { %v75_v2 = vsub.f32 %v73_v0, %v74_v1  ;;  %v94_v18 = vld [vmem:[%s239_s2] sm:$0xff]  ;;  %s119_s20 = sshll.u32 %s202_s19, 4  ;;  %s121_s2 = sshll.u32 %s240_s3, 4  ;;  %s120_s20 = int_to_ptr.vmem [resolvable:$true] %s119_s20  ;;  %s122_s2 = int_to_ptr.hbm [resolvable:$true] %s121_s2 }
   0x8   :  { %v95_v20 = vsub.f32 1.0, %v94_v18 }
   0x9   :  { %v76_v3 = vadd.f32 1e-06, %v75_v2 }
   0xb   :  { %v77_v4 = vmul.f32 %v76_v3, %v76_v3 }
   0xd   :  { %v79_v5 = vsel %vm78_vm0, %v77_v4, 0.0  ;;  %v102_v32 = vld [vmem:[#allocation5] sm:$0x1] }
   0xe   :  { %80 = vadd.xlane.f32.xlu0 %v79_v5 }
  0x81   :  { %v81_v7 = vpop.xlane.xlu0 %80 }
  0x82   :  { %146 = vrsqrt.f32 %v81_v7  ;;  %vm89_vm2 = vcmp.eq.f32.partialorder %v81_v7, inf  ;;  %v92_v15 = vand.u32 2147483648, %v81_v7  ;;  %vm91_vm3 = vcmp.eq.f32.partialorder %v81_v7, 0.0 }
  0x83   :  { %v96_v23 = vmul.f32 %v95_v20, %v81_v7 }
  0x88   :  { %v147_v8 = vpop.eup %146 }
  0x89   :  { %v83_v9 = vmul.f32 %v147_v8, %v81_v7 }
  0x8b   :  { %v84_v10 = vmul.f32 %v147_v8, %v83_v9 }
  0x8d   :  { %v85_v11 = vmul.f32 0.5, %v84_v10 }
  0x8f   :  { %v86_v12 = vsub.f32 1.5, %v85_v11 }
  0x91   :  { %v87_v13 = vmul.f32 %v147_v8, %v86_v12 }
  0x93   :  { %v88_v14 = vmul.f32 %v87_v13, %v81_v7 }
  0x95   :  { %v90_v16 = vsel %vm89_vm2, %v81_v7, %v88_v14 }
  0x96   :  { %v93_v17 = vsel %vm91_vm3, %v92_v15, %v90_v16 }
  0x97   :  { %v97_v19 = vsub.f32 2.0, %v93_v17 }
  0x99   :  { %v98_v21 = vmax.f32 %v97_v19, 0.0 }
  0x9b   :  { %v99_v22 = vmul.f32 %v98_v21, %v98_v21 }
  0x9d   :  { %v100_v24 = vmul.f32 %v99_v22, %v94_v18 }
  0x9f   :  { %v101_v25 = vadd.f32 %v100_v24, %v96_v23 }
  0xa1   :  { %v104_v26 = vsel %vm103_vm4, %v101_v25, 0.0 }
  0xa2   :  { %v105_v27 = vrot.slane %v104_v26, 4 }
  0xa4   :  { %v106_v28 = vadd.f32 %v105_v27, %v104_v26 }
  0xa6   :  { %v107_v29 = vrot.slane %v106_v28, 2 }
  0xa8   :  { %v108_v30 = vadd.f32 %v107_v29, %v106_v28 }
  0xaa   :  { %v109_v31 = vrot.slane %v108_v30, 1 }
  0xac   :  { %v110_v33 = vadd.f32 %v109_v31, %v108_v30 }
  0xae   :  { %v111_v34 = vadd.f32 %v110_v33, %v102_v32 }
  0xb0   :  { %113 = vst.msk [vmem:[#allocation5] sm:$0x1] %vm71_vm1, %v111_v34 }
  0xb1   :  { %124 = dma.vmem_to_hbm [thread:$0]  %s120_s20, 16, %s122_s2, [#allocation4]  }
  0xb2   :  { %198 = dma.done.wait [#allocation4], 16  }
  0xb3   :  { %199 = vsyncadd [#allocation4], 4294967280 }
  0xb4   :  { %129 = vsyncpa [#allocation3], 1 }
  0xb5   :  { %130 = vsyncpa [#allocation4], 1 }

</bundles_post_ra>
